<compile_context>
chip_gen: v5e
topology: v5e:2x2
jax: 0.10.0
libtpu: 0.0.40
codegen_flags: <defaults>
</compile_context>

<pallas_src>
import functools

import jax
import jax.numpy as jnp
from jax.experimental import pallas as pl
from jax.experimental.pallas import tpu as pltpu


def _round_up(x, m):
    return (x + m - 1) // m * m


def _pad_to(a, shape):
    return jnp.pad(a, [(0, s - d) for d, s in zip(a.shape, shape)])


# ----------------------------------------------------------------------------
# Pallas kernel: whole MLP forward for one (TM, *) batch tile, fused in VMEM.
# refs = (x, w_first, b_first, [w_mid_stack, b_mid_stack,] w_last, b_last, out)
# ----------------------------------------------------------------------------
def _mlp_kernel(*refs, num_mid):
    x_ref, w0_ref, b0_ref = refs[0], refs[1], refs[2]
    if num_mid > 0:
        wm_ref, bm_ref = refs[3], refs[4]
        wl_ref, bl_ref, o_ref = refs[5], refs[6], refs[7]
    else:
        wm_ref = bm_ref = None
        wl_ref, bl_ref, o_ref = refs[3], refs[4], refs[5]

    cdt = w0_ref.dtype  # MXU input dtype (bf16); accumulation is always f32.

    # First layer + ReLU (bias add / ReLU in f32).
    h = jnp.dot(x_ref[...], w0_ref[...], preferred_element_type=jnp.float32)
    h = jnp.maximum(h + b0_ref[...], 0.0)

    # Hidden (H, H) layers, statically unrolled over the stacked slab.
    for l in range(num_mid):
        h = jnp.dot(h.astype(cdt), wm_ref[l], preferred_element_type=jnp.float32)
        h = jnp.maximum(h + bm_ref[l], 0.0)

    # Last layer: no activation; output slab is lane-dense (out dim padded to 128).
    out = jnp.dot(h.astype(cdt), wl_ref[...], preferred_element_type=jnp.float32)
    o_ref[...] = (out + bl_ref[...]).astype(o_ref.dtype)


def twin_network_forward(x, params, *, compute_dtype=jnp.bfloat16, tm_max=1024):
    """x: (batch, nb_inputs) f32; params: list of (W_(in,out), b_(1,out)) f32."""
    num_layers = len(params)
    assert num_layers >= 2, "expect at least one hidden layer plus output layer"
    batch, nb_in = x.shape
    hidden = params[0][0].shape[1]
    out_dim = params[-1][0].shape[1]
    num_mid = num_layers - 2

    # Lane-pad every feature dim to a multiple of 128 (zero pads -> exact).
    in_p = _round_up(nb_in, 128)
    h_p = _round_up(hidden, 128)
    out_p = _round_up(out_dim, 128)

    # Batch tiling: TM rows per grid step (sublane-aligned); batch zero-padded
    # to a whole number of tiles so no partial blocks are needed.
    tm = min(tm_max, _round_up(batch, 8))
    batch_p = _round_up(batch, tm)
    grid = (batch_p // tm,)

    xp = _pad_to(x, (batch_p, in_p)).astype(compute_dtype)

    w0, b0 = params[0]
    w0p = _pad_to(w0, (in_p, h_p)).astype(compute_dtype)
    b0p = _pad_to(b0, (1, h_p)).astype(jnp.float32)
    wl, bl = params[-1]
    wlp = _pad_to(wl, (h_p, out_p)).astype(compute_dtype)
    blp = _pad_to(bl, (1, out_p)).astype(jnp.float32)

    inputs = [xp, w0p, b0p]
    in_specs = [
        pl.BlockSpec((tm, in_p), lambda i: (i, 0)),    # batch-tiled activations
        pl.BlockSpec((in_p, h_p), lambda i: (0, 0)),   # resident weights
        pl.BlockSpec((1, h_p), lambda i: (0, 0)),
    ]
    if num_mid > 0:
        wmp = jnp.stack([_pad_to(w, (h_p, h_p)) for (w, _) in params[1:-1]])
        bmp = jnp.stack([_pad_to(b, (1, h_p)) for (_, b) in params[1:-1]])
        inputs += [wmp.astype(compute_dtype), bmp.astype(jnp.float32)]
        in_specs += [
            pl.BlockSpec((num_mid, h_p, h_p), lambda i: (0, 0, 0)),
            pl.BlockSpec((num_mid, 1, h_p), lambda i: (0, 0, 0)),
        ]
    inputs += [wlp, blp]
    in_specs += [
        pl.BlockSpec((h_p, out_p), lambda i: (0, 0)),
        pl.BlockSpec((1, out_p), lambda i: (0, 0)),
    ]
    out_spec = pl.BlockSpec((tm, out_p), lambda i: (i, 0))

    param_bytes = sum(int(a.size) * a.dtype.itemsize for a in inputs[1:])
    act_bytes = int(xp.size) * xp.dtype.itemsize + batch_p * out_p * 4
    flops = 2 * batch_p * (in_p * h_p + num_mid * h_p * h_p + h_p * out_p)
    cost = pl.CostEstimate(flops=flops, transcendentals=0,
                           bytes_accessed=param_bytes + act_bytes)

    kernel = functools.partial(_mlp_kernel, num_mid=num_mid)

    out_full = pl.pallas_call(
        kernel,
        grid=grid,
        in_specs=in_specs,
        out_specs=out_spec,
        out_shape=jax.ShapeDtypeStruct((batch_p, out_p), jnp.float32),
        compiler_params=pltpu.CompilerParams(
            dimension_semantics=("parallel",),     # megacore batch sharding (v7x)
            vmem_limit_bytes=32 * 1024 * 1024,     # sized for v7x's 64 MiB VMEM
        ),
        cost_estimate=cost,
    )(*inputs)

    # Drop batch / lane padding (the padded output columns are exactly zero).
    return out_full[:batch, :out_dim]


# ----------------------------------------------------------------------------
# Deterministic parameter init (mirrors nn.Linear + kaiming_normal_(fan_in)).
# ----------------------------------------------------------------------------
def init_twin_network_params(key, nb_inputs, nb_hidden_layer, nb_neurones):
    dims = [nb_inputs] + [nb_neurones] * nb_hidden_layer + [1]
    params = []
    for i in range(nb_hidden_layer + 1):
        fan_in, fan_out = dims[i], dims[i + 1]
        key, kw, kb = jax.random.split(key, 3)
        # kaiming_normal_ (fan_in, default nonlinearity) -> std = sqrt(2/fan_in)
        w = jax.random.normal(kw, (fan_in, fan_out), jnp.float32) * jnp.sqrt(2.0 / fan_in)
        # default nn.Linear bias init: U(-1/sqrt(fan_in), 1/sqrt(fan_in))
        bound = 1.0 / jnp.sqrt(float(fan_in))
        b = jax.random.uniform(kb, (1, fan_out), jnp.float32, -bound, bound)
        params.append((w, b))
    return params


# Pure-JAX references for sanity checks.
def _reference_forward_f32(x, params):
    h = x
    for i, (w, b) in enumerate(params):
        h = h @ w + b
        if i < len(params) - 1:
            h = jnp.maximum(h, 0.0)
    return h


def _reference_forward_matched(x, params, compute_dtype):
    # Mimics the kernel's dtype policy: bf16 matmul inputs, f32 accumulation,
    # f32 bias add / ReLU.
    h = x.astype(compute_dtype)
    for i, (w, b) in enumerate(params):
        h = jnp.dot(h, w.astype(compute_dtype),
                    preferred_element_type=jnp.float32) + b
        if i < len(params) - 1:
            h = jnp.maximum(h, 0.0).astype(compute_dtype)
    return h


if __name__ == "__main__":
    nb_inputs = 32
    nb_hidden_layer = 3
    nb_neurones = 32
    batch = 8

    key = jax.random.PRNGKey(0)
    key, kx = jax.random.split(key)
    x = jax.random.normal(kx, (batch, nb_inputs), jnp.float32)
    params = init_twin_network_params(key, nb_inputs, nb_hidden_layer, nb_neurones)

    out = jax.block_until_ready(twin_network_forward(x, params))
    assert out.shape == (batch, 1)

    # Tight check against a reference using the same dtype policy as the kernel.
    ref_matched = _reference_forward_matched(x, params, jnp.bfloat16)
    assert jnp.allclose(out, ref_matched, atol=1e-3, rtol=1e-3), \
        "mismatch vs dtype-matched reference"

    # Loose sanity check against the pure f32 reference (bf16 matmul rounding).
    ref_f32 = _reference_forward_f32(x, params)
    assert jnp.allclose(out, ref_f32, atol=1e-1, rtol=1e-1), \
        "mismatch vs f32 reference"

    # TODO(synk): predict_price_and_diffs needs the backward pass; wrap
    # twin_network_forward with jax.grad instead of a hand-written kernel.
    print("KERNEL_OK")
</pallas_src>

<mosaic_0001>
module attributes {stable_mosaic.version = 11 : i64} {
  func.func @_mlp_kernel(%arg0: i32, %arg1: memref<8x128xbf16, #tpu.memory_space<vmem>>, %arg2: memref<128x128xbf16, #tpu.memory_space<vmem>>, %arg3: memref<1x128xf32, #tpu.memory_space<vmem>>, %arg4: memref<2x128x128xbf16, #tpu.memory_space<vmem>>, %arg5: memref<2x1x128xf32, #tpu.memory_space<vmem>>, %arg6: memref<128x128xbf16, #tpu.memory_space<vmem>>, %arg7: memref<1x128xf32, #tpu.memory_space<vmem>>, %arg8: memref<8x128xf32, #tpu.memory_space<vmem>>) attributes {dimension_semantics = [#tpu.dimension_semantics<parallel>], iteration_bounds = array<i64: 1>, scalar_prefetch = 0 : i64, scratch_operands = 0 : i64, tpu.core_type = #tpu.core_type<tc>, window_params = [{transform_indices = @transform_0, window_bounds = array<i64: 8, 128>}, {pipeline_mode = #tpu.pipeline_mode<synchronous>, transform_indices = @transform_1, window_bounds = array<i64: 128, 128>}, {pipeline_mode = #tpu.pipeline_mode<synchronous>, transform_indices = @transform_2, window_bounds = array<i64: 1, 128>}, {pipeline_mode = #tpu.pipeline_mode<synchronous>, transform_indices = @transform_3, window_bounds = array<i64: 2, 128, 128>}, {pipeline_mode = #tpu.pipeline_mode<synchronous>, transform_indices = @transform_4, window_bounds = array<i64: 2, 1, 128>}, {pipeline_mode = #tpu.pipeline_mode<synchronous>, transform_indices = @transform_5, window_bounds = array<i64: 128, 128>}, {pipeline_mode = #tpu.pipeline_mode<synchronous>, transform_indices = @transform_6, window_bounds = array<i64: 1, 128>}, {transform_indices = @transform_7, window_bounds = array<i64: 8, 128>}]} {
    %c0 = arith.constant 0 : index
    %c0_0 = arith.constant 0 : index
    %0 = vector.load %arg1[%c0, %c0_0] : memref<8x128xbf16, #tpu.memory_space<vmem>>, vector<8x128xbf16>
    %c0_1 = arith.constant 0 : index
    %c0_2 = arith.constant 0 : index
    %1 = vector.load %arg2[%c0_1, %c0_2] : memref<128x128xbf16, #tpu.memory_space<vmem>>, vector<128x128xbf16>
    %cst = arith.constant dense<0.000000e+00> : vector<8x128xf32>
    %2 = tpu.matmul %0, %1, %cst {dimension_numbers = #tpu.dot_dimension_numbers<[1], [0], [0], [1], [0, 0, 1, 1], [], []>} : vector<8x128xbf16>, vector<128x128xbf16>, vector<8x128xf32> -> vector<8x128xf32>
    %c0_3 = arith.constant 0 : index
    %c0_4 = arith.constant 0 : index
    %3 = vector.load %arg3[%c0_3, %c0_4] : memref<1x128xf32, #tpu.memory_space<vmem>>, vector<1x128xf32>
    %4 = vector.broadcast %3 : vector<1x128xf32> to vector<8x128xf32>
    %5 = arith.addf %2, %4 : vector<8x128xf32>
    %cst_5 = arith.constant 0.000000e+00 : f32
    %6 = vector.broadcast %cst_5 : f32 to vector<8x128xf32>
    %7 = arith.maximumf %5, %6 : vector<8x128xf32>
    %8 = arith.truncf %7 : vector<8x128xf32> to vector<8x128xbf16>
    %c0_6 = arith.constant 0 : index
    %c0_7 = arith.constant 0 : index
    %c0_8 = arith.constant 0 : index
    %9 = vector.load %arg4[%c0_6, %c0_7, %c0_8] : memref<2x128x128xbf16, #tpu.memory_space<vmem>>, vector<1x128x128xbf16>
    %10 = vector.shape_cast %9 : vector<1x128x128xbf16> to vector<128x128xbf16>
    %cst_9 = arith.constant dense<0.000000e+00> : vector<8x128xf32>
    %11 = tpu.matmul %8, %10, %cst_9 {dimension_numbers = #tpu.dot_dimension_numbers<[1], [0], [0], [1], [0, 0, 1, 1], [], []>} : vector<8x128xbf16>, vector<128x128xbf16>, vector<8x128xf32> -> vector<8x128xf32>
    %c0_10 = arith.constant 0 : index
    %c0_11 = arith.constant 0 : index
    %c0_12 = arith.constant 0 : index
    %12 = vector.load %arg5[%c0_10, %c0_11, %c0_12] : memref<2x1x128xf32, #tpu.memory_space<vmem>>, vector<1x1x128xf32>
    %13 = vector.shape_cast %12 : vector<1x1x128xf32> to vector<1x128xf32>
    %14 = vector.broadcast %13 : vector<1x128xf32> to vector<8x128xf32>
    %15 = arith.addf %11, %14 : vector<8x128xf32>
    %cst_13 = arith.constant 0.000000e+00 : f32
    %16 = vector.broadcast %cst_13 : f32 to vector<8x128xf32>
    %17 = arith.maximumf %15, %16 : vector<8x128xf32>
    %18 = arith.truncf %17 : vector<8x128xf32> to vector<8x128xbf16>
    %c1 = arith.constant 1 : index
    %c0_14 = arith.constant 0 : index
    %c0_15 = arith.constant 0 : index
    %19 = vector.load %arg4[%c1, %c0_14, %c0_15] : memref<2x128x128xbf16, #tpu.memory_space<vmem>>, vector<1x128x128xbf16>
    %20 = vector.shape_cast %19 : vector<1x128x128xbf16> to vector<128x128xbf16>
    %cst_16 = arith.constant dense<0.000000e+00> : vector<8x128xf32>
    %21 = tpu.matmul %18, %20, %cst_16 {dimension_numbers = #tpu.dot_dimension_numbers<[1], [0], [0], [1], [0, 0, 1, 1], [], []>} : vector<8x128xbf16>, vector<128x128xbf16>, vector<8x128xf32> -> vector<8x128xf32>
    %c1_17 = arith.constant 1 : index
    %c0_18 = arith.constant 0 : index
    %c0_19 = arith.constant 0 : index
    %22 = vector.load %arg5[%c1_17, %c0_18, %c0_19] : memref<2x1x128xf32, #tpu.memory_space<vmem>>, vector<1x1x128xf32>
    %23 = vector.shape_cast %22 : vector<1x1x128xf32> to vector<1x128xf32>
    %24 = vector.broadcast %23 : vector<1x128xf32> to vector<8x128xf32>
    %25 = arith.addf %21, %24 : vector<8x128xf32>
    %cst_20 = arith.constant 0.000000e+00 : f32
    %26 = vector.broadcast %cst_20 : f32 to vector<8x128xf32>
    %27 = arith.maximumf %25, %26 : vector<8x128xf32>
    %28 = arith.truncf %27 : vector<8x128xf32> to vector<8x128xbf16>
    %c0_21 = arith.constant 0 : index
    %c0_22 = arith.constant 0 : index
    %29 = vector.load %arg6[%c0_21, %c0_22] : memref<128x128xbf16, #tpu.memory_space<vmem>>, vector<128x128xbf16>
    %cst_23 = arith.constant dense<0.000000e+00> : vector<8x128xf32>
    %30 = tpu.matmul %28, %29, %cst_23 {dimension_numbers = #tpu.dot_dimension_numbers<[1], [0], [0], [1], [0, 0, 1, 1], [], []>} : vector<8x128xbf16>, vector<128x128xbf16>, vector<8x128xf32> -> vector<8x128xf32>
    %c0_24 = arith.constant 0 : index
    %c0_25 = arith.constant 0 : index
    %31 = vector.load %arg7[%c0_24, %c0_25] : memref<1x128xf32, #tpu.memory_space<vmem>>, vector<1x128xf32>
    %32 = vector.broadcast %31 : vector<1x128xf32> to vector<8x128xf32>
    %33 = arith.addf %30, %32 : vector<8x128xf32>
    %c0_26 = arith.constant 0 : index
    %c0_27 = arith.constant 0 : index
    %34 = vector.load %arg8[%c0_26, %c0_27] : memref<8x128xf32, #tpu.memory_space<vmem>>, vector<8x128xf32>
    tpu.vector_store %arg8[%c0_26, %c0_27], %33 {strides = array<i32>} : memref<8x128xf32, #tpu.memory_space<vmem>>, vector<8x128xf32>,
    return
  }
  func.func @transform_0(%arg0: i32) -> (i32, i32) {
    %c0_i32 = arith.constant 0 : i32
    %c0_i32_0 = arith.constant 0 : i32
    return %arg0, %c0_i32 : i32, i32
  }
  func.func @transform_1(%arg0: i32) -> (i32, i32) {
    %c0_i32 = arith.constant 0 : i32
    %c0_i32_0 = arith.constant 0 : i32
    %c0_i32_1 = arith.constant 0 : i32
    return %c0_i32, %c0_i32_0 : i32, i32
  }
  func.func @transform_2(%arg0: i32) -> (i32, i32) {
    %c0_i32 = arith.constant 0 : i32
    %c0_i32_0 = arith.constant 0 : i32
    %c0_i32_1 = arith.constant 0 : i32
    return %c0_i32, %c0_i32_0 : i32, i32
  }
  func.func @transform_3(%arg0: i32) -> (i32, i32, i32) {
    %c0_i32 = arith.constant 0 : i32
    %c0_i32_0 = arith.constant 0 : i32
    %c0_i32_1 = arith.constant 0 : i32
    %c0_i32_2 = arith.constant 0 : i32
    return %c0_i32, %c0_i32_0, %c0_i32_1 : i32, i32, i32
  }
  func.func @transform_4(%arg0: i32) -> (i32, i32, i32) {
    %c0_i32 = arith.constant 0 : i32
    %c0_i32_0 = arith.constant 0 : i32
    %c0_i32_1 = arith.constant 0 : i32
    %c0_i32_2 = arith.constant 0 : i32
    return %c0_i32, %c0_i32_0, %c0_i32_1 : i32, i32, i32
  }
  func.func @transform_5(%arg0: i32) -> (i32, i32) {
    %c0_i32 = arith.constant 0 : i32
    %c0_i32_0 = arith.constant 0 : i32
    %c0_i32_1 = arith.constant 0 : i32
    return %c0_i32, %c0_i32_0 : i32, i32
  }
  func.func @transform_6(%arg0: i32) -> (i32, i32) {
    %c0_i32 = arith.constant 0 : i32
    %c0_i32_0 = arith.constant 0 : i32
    %c0_i32_1 = arith.constant 0 : i32
    return %c0_i32, %c0_i32_0 : i32, i32
  }
  func.func @transform_7(%arg0: i32) -> (i32, i32) {
    %c0_i32 = arith.constant 0 : i32
    %c0_i32_0 = arith.constant 0 : i32
    return %arg0, %c0_i32 : i32, i32
  }
}

</mosaic_0001>

<bundles_post_ra>
// kernel: tpu_custom_call.1
= control target key start
LH: loop header
LB: loop body
LE: loop exit
PB: predicated region body
PF: predicated region fallthrough
CT: control target
= control target key end

     0   :  { %12 = vsyncpa [#allocation3], 0  ;;  %s815_s0 = inlined_call_operand.hbm [shape: bf16[8,128], index: 0, kind: input, shape index: {}]   ;;  %s816_s1 = inlined_call_operand.hbm [shape: bf16[128,128], index: 1, kind: input, shape index: {}]   ;;  %s817_s2 = inlined_call_operand.vmem [shape: f32[1,128], index: 2, kind: input, shape index: {}]   ;;  %s818_s3 = inlined_call_operand.hbm [shape: bf16[2,128,128], index: 3, kind: input, shape index: {}]   ;;  %s819_s4 = inlined_call_operand.vmem [shape: f32[2,1,128], index: 4, kind: input, shape index: {}]   ;;  %s820_s5 = inlined_call_operand.hbm [shape: bf16[128,128], index: 5, kind: input, shape index: {}]   ;;  %s821_s6 = inlined_call_operand.vmem [shape: f32[1,128], index: 6, kind: input, shape index: {}]   ;;  %s822_s7 = inlined_call_operand.hbm [shape: f32[8,128], index: 7, kind: output, shape index: {}]  }
   0x1   :  { %13 = vsyncpa [#allocation6], 0 }
   0x2   :  { %14 = vsyncpa [#allocation9], 0  ;;  %s31_s26 = sshll.u32 %s816_s1, 4  ;;  %s32_s26 = int_to_ptr.hbm [resolvable:$true] %s31_s26 }
   0x3   :  { %15 = vsyncpa [#allocation4], 0  ;;  %s741_s27 = smov [#allocation5]   ;;  %s21_s8 = sshll.u32 %s815_s0, 4  ;;  %s22_s8 = int_to_ptr.hbm [resolvable:$true] %s21_s8 }
   0x4   :  { %s33_s28 = sshll.u32 %s741_s27, 4  ;;  %s742_s9 = smov 64   ;;  %s34_s28 = int_to_ptr.vmem [resolvable:$true] %s33_s28 }
   0x5   :  { %s743_s10 = smov 4   ;;  %s744_s11 = smov [#allocation2]  }
   0x6   :  { %39 = dma.hbm_to_vmem [thread:$0]  %s32_s26, 1024, %s34_s28, [#allocation6], %s742_s9, %s742_s9, %s743_s10  }
   0x7   :  { %s23_s12 = sshll.u32 %s744_s11, 4  ;;  %s46_s15 = sshll.u32 %s818_s3, 4  ;;  %s24_s12 = int_to_ptr.vmem [resolvable:$true] %s23_s12  ;;  %s47_s15 = int_to_ptr.hbm [resolvable:$true] %s46_s15 }
   0x8   :  { %26 = dma.hbm_to_vmem [thread:$0]  %s22_s8, 64, %s24_s12, [#allocation3]  }
   0x9   :  { %s61_s17 = sshll.u32 %s820_s5, 4  ;;  %s745_s18 = smov [#allocation7]   ;;  %s62_s17 = int_to_ptr.hbm [resolvable:$true] %s61_s17 }
   0xa   :  { %s48_s19 = sshll.u32 %s745_s18, 4  ;;  %s746_s0 = smov [#allocation8]   ;;  %s49_s19 = int_to_ptr.vmem [resolvable:$true] %s48_s19 }
   0xb   :  { %54 = dma.hbm_to_vmem [thread:$0]  %s47_s15, 2048, %s49_s19, [#allocation6], %s742_s9, %s742_s9, %s743_s10  }
   0xc   :  { %s63_s20 = sshll.u32 %s746_s0, 4  ;;  %s64_s20 = int_to_ptr.vmem [resolvable:$true] %s63_s20 }
   0xd   :  { %69 = dma.hbm_to_vmem [thread:$0]  %s62_s17, 1024, %s64_s20, [#allocation9], %s742_s9, %s742_s9, %s743_s10  }
   0xe   :  { %733 = dma.done.wait [#allocation3], 64  }
   0xf   :  { %734 = vsyncadd [#allocation3], 4294967232 }
  0x10   :  { %735 = dma.done.wait [#allocation6], 3072  }
  0x11   :  { %736 = vsyncadd [#allocation6], 4294964224 }
  0x12   :  { %737 = dma.done.wait [#allocation9], 1024  }
  0x13   :  { %738 = vsyncadd [#allocation9], 4294966272  ;;  %v577_v0 = vld [vmem:[#allocation5 + $0x38] sm:$0xff]  ;;  %v576_v1 = vld [vmem:[#allocation5 + $0x30] sm:$0xff]  ;;  %s747_s26 = smov [#allocation10]   ;;  %s429_s30 = sshll.u32 %s822_s7, 4  ;;  %s430_s30 = int_to_ptr.hbm [resolvable:$true] %s429_s30 }
  0x14   :  { %157 = vmatpush.bf16.msra.mxu0 %v577_v0  ;;  %v585_v2 = vld [vmem:[#allocation7 + $0x38] sm:$0xff]  ;;  %v584_v3 = vld [vmem:[#allocation7 + $0x30] sm:$0xff]  ;;  %v575_v4 = vld [vmem:[#allocation5 + $0x28] sm:$0xff]  ;;  %s427_s27 = sshll.u32 %s747_s26, 4  ;;  %s428_s27 = int_to_ptr.vmem [resolvable:$true] %s427_s27 }
  0x15   :  { %240 = vmatpush.bf16.msra.mxu1 %v585_v2  ;;  %v583_v5 = vld [vmem:[#allocation7 + $0x28] sm:$0xff]  ;;  %v574_v6 = vld [vmem:[#allocation5 + $0x20] sm:$0xff]  ;;  %v573_v8 = vld [vmem:[#allocation5 + $0x18] sm:$0xff] }
  0x16   :  { %v582_v7 = vld [vmem:[#allocation7 + $0x20] sm:$0xff]  ;;  %v581_v9 = vld [vmem:[#allocation7 + $0x18] sm:$0xff]  ;;  %v572_v10 = vld [vmem:[#allocation5 + $0x10] sm:$0xff] }
  0x17   :  { %v580_v11 = vld [vmem:[#allocation7 + $0x10] sm:$0xff]  ;;  %v571_v12 = vld [vmem:[#allocation5 + $0x8] sm:$0xff]  ;;  %v570_v13 = vld [vmem:[#allocation5] sm:$0xff] }
  0x18   :  { %158 = vmatpush.bf16.msra.mxu0 %v576_v1  ;;  %v88_v14 = vld [vmem:[#allocation2] sm:$0xf]  ;;  %v579_v15 = vld [vmem:[#allocation7 + $0x8] sm:$0xff]  ;;  %v578_v16 = vld [vmem:[#allocation7] sm:$0xff] }
  0x19   :  { %241 = vmatpush.bf16.msra.mxu1 %v584_v3  ;;  %v593_v17 = vld [vmem:[#allocation7 + $0x78] sm:$0xff]  ;;  %v592_v18 = vld [vmem:[#allocation7 + $0x70] sm:$0xff]  ;;  %v591_v19 = vld [vmem:[#allocation7 + $0x68] sm:$0xff] }
  0x1a   :  { %325 = vmatpush.bf16.msra.mxu2 %v593_v17  ;;  %v590_v20 = vld [vmem:[#allocation7 + $0x60] sm:$0xff]  ;;  %v589_v21 = vld [vmem:[#allocation7 + $0x58] sm:$0xff]  ;;  %v588_v22 = vld [vmem:[#allocation7 + $0x50] sm:$0xff] }
  0x1b   :  { %v609_v23 = vld [vmem:[%s817_s2] ss:$0 sm:$0xff]  ;;  %v587_v29 = vld [vmem:[#allocation7 + $0x48] sm:$0xff]  ;;  %v586_v30 = vld [vmem:[#allocation7 + $0x40] sm:$0xff] }
  0x1c   :  { %159 = vmatpush.bf16.msra.mxu0 %v575_v4  ;;  %v601_v31 = vld [vmem:[#allocation8 + $0x38] sm:$0xff]  ;;  %v600_v32 = vld [vmem:[#allocation8 + $0x30] sm:$0xff]  ;;  %v599_v33 = vld [vmem:[#allocation8 + $0x28] sm:$0xff] }
  0x1d   :  { %242 = vmatpush.bf16.msra.mxu1 %v583_v5  ;;  %408 = vmatpush.bf16.msra.mxu3 %v601_v31  ;;  %v598_v34 = vld [vmem:[#allocation8 + $0x20] sm:$0xff]  ;;  %v597_v35 = vld [vmem:[#allocation8 + $0x18] sm:$0xff]  ;;  %v596_v36 = vld [vmem:[#allocation8 + $0x10] sm:$0xff] }
  0x1e   :  { %326 = vmatpush.bf16.msra.mxu2 %v592_v18  ;;  %v610_v37 = vld [vmem:[%s819_s4] ss:$0 sm:$0xff]  ;;  %v595_v43 = vld [vmem:[#allocation8 + $0x8] sm:$0xff]  ;;  %v594_v44 = vld [vmem:[#allocation8] sm:$0xff] }
  0x1f   :  { %v611_v45 = vld [vmem:[%s819_s4 + $0x1] ss:$0 sm:$0xff]  ;;  %v612_v51 = vld [vmem:[%s821_s6] ss:$0 sm:$0xff] }
  0x20   :  { %160 = vmatpush.bf16.msra.mxu0 %v574_v6 }
  0x21   :  { %243 = vmatpush.bf16.msra.mxu1 %v582_v7  ;;  %409 = vmatpush.bf16.msra.mxu3 %v600_v32 }
  0x22   :  { %327 = vmatpush.bf16.msra.mxu2 %v591_v19 }
  0x24   :  { %161 = vmatpush.bf16.msra.mxu0 %v573_v8 }
  0x25   :  { %244 = vmatpush.bf16.msra.mxu1 %v581_v9  ;;  %410 = vmatpush.bf16.msra.mxu3 %v599_v33 }
  0x26   :  { %328 = vmatpush.bf16.msra.mxu2 %v590_v20 }
  0x28   :  { %162 = vmatpush.bf16.msra.mxu0 %v572_v10 }
  0x29   :  { %245 = vmatpush.bf16.msra.mxu1 %v580_v11  ;;  %411 = vmatpush.bf16.msra.mxu3 %v598_v34 }
  0x2a   :  { %329 = vmatpush.bf16.msra.mxu2 %v589_v21 }
  0x2c   :  { %163 = vmatpush.bf16.msra.mxu0 %v571_v12 }
  0x2d   :  { %246 = vmatpush.bf16.msra.mxu1 %v579_v15  ;;  %412 = vmatpush.bf16.msra.mxu3 %v597_v35 }
  0x2e   :  { %330 = vmatpush.bf16.msra.mxu2 %v588_v22 }
  0x30   :  { %164 = vmatpush.bf16.msra.mxu0 %v570_v13 }
  0x31   :  { %247 = vmatpush.bf16.msra.mxu1 %v578_v16  ;;  %413 = vmatpush.bf16.msra.mxu3 %v596_v36 }
  0x32   :  { %331 = vmatpush.bf16.msra.mxu2 %v587_v29 }
  0x33   :  { %165 = vmatmul.bf16.vlgmr.msra.gmra.mxu0 %v88_v14 }
  0x35   :  { %414 = vmatpush.bf16.msra.mxu3 %v595_v43 }
  0x36   :  { %332 = vmatpush.bf16.msra.mxu2 %v586_v30 }
  0x39   :  { %415 = vmatpush.bf16.msra.mxu3 %v594_v44 }
  0xb0   :  { %v166_v24 = vpop.f32.mrf.mxu0 }
  0xb1   :  { %v167_v25 = vadd.f32 %v609_v23, %v166_v24 }
  0xb3   :  { %v170_v26 = vmax.f32 %v167_v25, 0.0 }
  0xb5   :  { %v171_v27 = vpack.c.bf16 %v170_v26, %v170_v26 }
  0xb7   :  { %248 = vmatmul.bf16.vlgmr.msra.gmra.mxu1 %v171_v27 }
  0xb8   :  { %v168_v28 = vpop.f32.mrf.mxu0 }
 0x134   :  { %v249_v38 = vpop.f32.mrf.mxu1 }
 0x135   :  { %v250_v39 = vadd.f32 %v610_v37, %v249_v38 }
 0x137   :  { %v253_v40 = vmax.f32 %v250_v39, 0.0 }
 0x139   :  { %v254_v41 = vpack.c.bf16 %v253_v40, %v253_v40 }
 0x13b   :  { %333 = vmatmul.bf16.vlgmr.msra.gmra.mxu2 %v254_v41 }
 0x13c   :  { %v251_v42 = vpop.f32.mrf.mxu1 }
 0x1be   :  { %v334_v46 = vpop.f32.mrf.mxu2 }
 0x1bf   :  { %v335_v47 = vadd.f32 %v611_v45, %v334_v46 }
 0x1c1   :  { %v338_v48 = vmax.f32 %v335_v47, 0.0 }
 0x1c3   :  { %v339_v49 = vpack.c.bf16 %v338_v48, %v338_v48 }
 0x1c5   :  { %416 = vmatmul.bf16.vlgmr.msra.gmra.mxu3 %v339_v49 }
 0x1c6   :  { %v336_v50 = vpop.f32.mrf.mxu2 }
 0x248   :  { %v417_v52 = vpop.f32.mrf.mxu3 }
 0x249   :  { %v418_v53 = vadd.f32 %v612_v51, %v417_v52 }
 0x24b   :  { %421 = vst [vmem:[#allocation10] sm:$0xff] %v418_v53 }
 0x24c   :  { %432 = dma.vmem_to_hbm [thread:$0]  %s428_s27, 128, %s430_s30, [#allocation4]  }
 0x250   :  { %v419_v54 = vpop.f32.mrf.mxu3 }
 0x251   :  { %739 = dma.done.wait [#allocation4], 128  }
 0x252   :  { %740 = vsyncadd [#allocation4], 4294967168 }
 0x253   :  { %437 = vsyncpa [#allocation3], 1 }
 0x254   :  { %438 = vsyncpa [#allocation6], 1 }
 0x255   :  { %439 = vsyncpa [#allocation9], 1 }
 0x256   :  { %440 = vsyncpa [#allocation4], 1 }

</bundles_post_ra>
